<compile_context>
chip_gen: v7x
topology: tpu7x:2x2x1
jax: 0.10.0
libtpu: 0.0.40
codegen_flags: <defaults>
</compile_context>

<pallas_src>
import jax
import jax.numpy as jnp
from jax.experimental import pallas as pl
from jax.experimental.pallas import tpu as pltpu


def _round_up(x, m):
    return (x + m - 1) // m * m


def mlp_kernel(x_ref, w1_ref, b1_ref, w2_ref, b2_ref, o_ref, acc_ref):
    """One (batch-tile, hidden-tile) step of relu(x@W1+b1) @ W2 + b2."""
    h_idx = pl.program_id(1)

    @pl.when(h_idx == 0)
    def _init():
        acc_ref[...] = jnp.zeros_like(acc_ref)

    # hidden tile in f32 on the MXU; ReLU is elementwise per hidden column,
    # so applying it per H-tile keeps the fusion exact.
    hidden = jnp.dot(x_ref[...], w1_ref[...], preferred_element_type=jnp.float32)
    hidden = jnp.maximum(hidden + b1_ref[...], 0.0)

    acc_ref[...] += jnp.dot(hidden.astype(w2_ref.dtype), w2_ref[...],
                            preferred_element_type=jnp.float32)

    @pl.when(h_idx == pl.num_programs(1) - 1)
    def _finalize():
        o_ref[...] = (acc_ref[...] + b2_ref[...]).astype(o_ref.dtype)


def prepare_params(w1, b1, w2, b2, *, compute_dtype=jnp.bfloat16,
                   lane_align=256, hidden_tile=512):
    """Pad + cast the weights ONCE.  Cache the result; do not re-pad per call.

    w1: (F, H)  b1: (H,) or (1, H)   w2: (H, O)  b2: (O,) or (1, O)
    lane_align=256 fills the full v6e/v7x MXU tile (use 128 on v5e if desired).
    """
    F, H = w1.shape
    O = w2.shape[1]

    Fp = _round_up(F, lane_align)
    Hp = _round_up(H, lane_align)
    Op = _round_up(O, lane_align)
    TH = min(Hp, _round_up(hidden_tile, lane_align))
    Hp = _round_up(Hp, TH)  # hidden tile divides the padded hidden dim exactly

    w1_p = jnp.zeros((Fp, Hp), compute_dtype).at[:F, :H].set(w1.astype(compute_dtype))
    b1_p = jnp.zeros((1, Hp), jnp.float32).at[:, :H].set(
        jnp.reshape(b1, (1, H)).astype(jnp.float32))
    w2_p = jnp.zeros((Hp, Op), compute_dtype).at[:H, :O].set(w2.astype(compute_dtype))
    b2_p = jnp.zeros((1, Op), jnp.float32).at[:, :O].set(
        jnp.reshape(b2, (1, O)).astype(jnp.float32))

    return dict(w1=w1_p, b1=b1_p, w2=w2_p, b2=b2_p,
                dims=(F, H, O), padded=(Fp, Hp, Op), hidden_tile=TH,
                compute_dtype=compute_dtype)


def net_forward(x, params, *, batch_tile=256, out_dtype=jnp.float32):
    """Forward pass of Net. x: (B, F) -> (B, O) in out_dtype.

    out_dtype=jnp.bfloat16 halves output HBM/store traffic if downstream allows
    (helps v5e's single vst slot).
    """
    F, H, O = params["dims"]
    Fp, Hp, Op = params["padded"]
    TH = params["hidden_tile"]
    compute_dtype = params["compute_dtype"]
    w1_p, b1_p, w2_p, b2_p = params["w1"], params["b1"], params["w2"], params["b2"]

    B = x.shape[0]
    assert x.shape == (B, F)

    # Batch tile: multiple of 8 sublanes, capped at batch_tile.  Prefer >= 2
    # batch grid steps so v7x's two TensorCores both get work (no-op on v5e/v6e).
    TB = _round_up(min(batch_tile, _round_up(B, 8)), 8)
    while TB > 8 and _round_up(B, TB) // TB < 2:
        TB = _round_up(TB // 2, 8)
    Bp = _round_up(B, TB)

    # Only the activations are padded per call; weights were padded once.
    x_p = jnp.zeros((Bp, Fp), compute_dtype).at[:B, :F].set(x.astype(compute_dtype))

    n_b = Bp // TB
    n_h = Hp // TH
    grid = (n_b, n_h)

    # Blocks whose index never changes can be single-buffered (halves their
    # VMEM footprint): b2 always; W1/b1/W2 too when all of H fits in one tile.
    def _spec(shape, index_map, constant=False):
        if constant:
            return pl.BlockSpec(shape, index_map, pipeline_mode=pl.Buffered(1))
        return pl.BlockSpec(shape, index_map)

    weights_resident = (n_h == 1)

    csize = jnp.dtype(compute_dtype).itemsize
    osize = jnp.dtype(out_dtype).itemsize
    # VMEM budget from the actual allocation (counting 2 buffers as upper bound
    # for the pipelined specs) + the (TB, TH) f32 hidden temp + headroom.
    vmem_bytes = (2 * TB * Fp * csize          # x
                  + 2 * Fp * TH * csize        # w1
                  + 2 * TH * 4                 # b1 (f32)
                  + 2 * TH * Op * csize        # w2
                  + 1 * Op * 4                 # b2 (single-buffered, f32)
                  + 2 * TB * Op * osize        # out
                  + TB * Op * 4                # f32 accumulator scratch
                  + TB * TH * 4)               # f32 hidden temporary
    vmem_limit = min(max(int(vmem_bytes * 1.5) + (4 << 20), 32 << 20), 64 << 20)

    cost = pl.CostEstimate(
        flops=2 * B * (F * H + H * O),
        transcendentals=0,
        bytes_accessed=int(x_p.size * csize + w1_p.size * csize
                           + w2_p.size * csize + b1_p.size * 4 + b2_p.size * 4
                           + Bp * Op * osize),
    )

    out_p = pl.pallas_call(
        mlp_kernel,
        out_shape=jax.ShapeDtypeStruct((Bp, Op), out_dtype),
        grid_spec=pltpu.PrefetchScalarGridSpec(
            num_scalar_prefetch=0,
            grid=grid,
            in_specs=[
                _spec((TB, Fp), lambda i, h: (i, 0)),                      # x
                _spec((Fp, TH), lambda i, h: (0, h), weights_resident),    # W1
                _spec((1, TH), lambda i, h: (0, h), weights_resident),     # b1
                _spec((TH, Op), lambda i, h: (h, 0), weights_resident),    # W2
                _spec((1, Op), lambda i, h: (0, 0), True),                 # b2
            ],
            out_specs=pl.BlockSpec((TB, Op), lambda i, h: (i, 0)),
            scratch_shapes=[pltpu.VMEM((TB, Op), jnp.float32)],
        ),
        compiler_params=pltpu.CompilerParams(
            # batch steps independent -> shard across v7x's TCs; hidden is the
            # resident-accumulator reduction axis.
            dimension_semantics=("parallel", "arbitrary"),
            vmem_limit_bytes=vmem_limit,
        ),
        cost_estimate=cost,
    )(x_p, w1_p, b1_p, w2_p, b2_p)

    return out_p[:B, :O]


if __name__ == "__main__":
    # Small shapes consistent with Net(n_feature, n_hidden, n_output).
    B, n_feature, n_hidden, n_output = 8, 32, 64, 16

    key = jax.random.PRNGKey(0)
    kx, kw1, kb1, kw2, kb2 = jax.random.split(key, 5)

    x = jax.random.normal(kx, (B, n_feature), dtype=jnp.float32)

    # PyTorch-style uniform init bounds (synthetic values).
    bound1 = 1.0 / jnp.sqrt(n_feature)
    w1 = jax.random.uniform(kw1, (n_feature, n_hidden), jnp.float32, -bound1, bound1)
    b1 = jax.random.uniform(kb1, (n_hidden,), jnp.float32, -bound1, bound1)

    bound2 = 1.0 / jnp.sqrt(n_hidden)
    w2 = jax.random.uniform(kw2, (n_hidden, n_output), jnp.float32, -bound2, bound2)
    b2 = jax.random.uniform(kb2, (n_output,), jnp.float32, -bound2, bound2)

    # Pad/cast the weights once (bf16 operands, f32 accumulation in-kernel).
    params = prepare_params(w1, b1, w2, b2, compute_dtype=jnp.bfloat16)

    out = net_forward(x, params)
    jax.block_until_ready(out)

    # Reference check against plain JAX (f32); loose tolerance for bf16 operands.
    ref = jnp.maximum(x @ w1 + b1[None, :], 0.0) @ w2 + b2[None, :]
    assert out.shape == (B, n_output)
    assert jnp.allclose(out, ref, atol=2e-2, rtol=2e-2), \
        float(jnp.max(jnp.abs(out - ref)))

    print("KERNEL_OK")
</pallas_src>

<mosaic_0001>
module attributes {stable_mosaic.version = 11 : i64} {
  func.func @mlp_kernel(%arg0: i32, %arg1: i32, %arg2: memref<8x256xbf16, #tpu.memory_space<vmem>>, %arg3: memref<256x256xbf16, #tpu.memory_space<vmem>>, %arg4: memref<1x256xf32, #tpu.memory_space<vmem>>, %arg5: memref<256x256xbf16, #tpu.memory_space<vmem>>, %arg6: memref<1x256xf32, #tpu.memory_space<vmem>>, %arg7: memref<8x256xf32, #tpu.memory_space<vmem>>, %arg8: memref<8x256xf32, #tpu.memory_space<vmem>>) attributes {dimension_semantics = [#tpu.dimension_semantics<parallel>, #tpu.dimension_semantics<arbitrary>], iteration_bounds = array<i64: 1, 1>, scalar_prefetch = 0 : i64, scratch_operands = 1 : i64, tpu.core_type = #tpu.core_type<tc>, window_params = [{transform_indices = @transform_0, window_bounds = array<i64: 8, 256>}, {pipeline_mode = #tpu.pipeline_mode<synchronous>, transform_indices = @transform_1, window_bounds = array<i64: 256, 256>}, {pipeline_mode = #tpu.pipeline_mode<synchronous>, transform_indices = @transform_2, window_bounds = array<i64: 1, 256>}, {pipeline_mode = #tpu.pipeline_mode<synchronous>, transform_indices = @transform_3, window_bounds = array<i64: 256, 256>}, {pipeline_mode = #tpu.pipeline_mode<synchronous>, transform_indices = @transform_4, window_bounds = array<i64: 1, 256>}, {transform_indices = @transform_5, window_bounds = array<i64: 8, 256>}]} {
    %c0_i32 = arith.constant 0 : i32
    %0 = arith.cmpi eq, %arg1, %c0_i32 : i32
    %1 = arith.extui %0 : i1 to i32
    %c0_i32_0 = arith.constant 0 : i32
    %2 = arith.cmpi ne, %1, %c0_i32_0 : i32
    scf.if %2 {
      %cst_16 = arith.constant 0.000000e+00 : f32
      %20 = vector.broadcast %cst_16 : f32 to vector<8x256xf32>
      %c0_17 = arith.constant 0 : index
      %c0_18 = arith.constant 0 : index
      %21 = vector.load %arg8[%c0_17, %c0_18] : memref<8x256xf32, #tpu.memory_space<vmem>>, vector<8x256xf32>
      tpu.vector_store %arg8[%c0_17, %c0_18], %20 {strides = array<i32>} : memref<8x256xf32, #tpu.memory_space<vmem>>, vector<8x256xf32>,
    } else {
    }
    %c0 = arith.constant 0 : index
    %c0_1 = arith.constant 0 : index
    %3 = vector.load %arg2[%c0, %c0_1] : memref<8x256xbf16, #tpu.memory_space<vmem>>, vector<8x256xbf16>
    %c0_2 = arith.constant 0 : index
    %c0_3 = arith.constant 0 : index
    %4 = vector.load %arg3[%c0_2, %c0_3] : memref<256x256xbf16, #tpu.memory_space<vmem>>, vector<256x256xbf16>
    %cst = arith.constant dense<0.000000e+00> : vector<8x256xf32>
    %5 = tpu.matmul %3, %4, %cst {dimension_numbers = #tpu.dot_dimension_numbers<[1], [0], [0], [1], [0, 0, 1, 1], [], []>} : vector<8x256xbf16>, vector<256x256xbf16>, vector<8x256xf32> -> vector<8x256xf32>
    %c0_4 = arith.constant 0 : index
    %c0_5 = arith.constant 0 : index
    %6 = vector.load %arg4[%c0_4, %c0_5] : memref<1x256xf32, #tpu.memory_space<vmem>>, vector<1x256xf32>
    %7 = vector.broadcast %6 : vector<1x256xf32> to vector<8x256xf32>
    %8 = arith.addf %5, %7 : vector<8x256xf32>
    %cst_6 = arith.constant 0.000000e+00 : f32
    %9 = vector.broadcast %cst_6 : f32 to vector<8x256xf32>
    %10 = arith.maximumf %8, %9 : vector<8x256xf32>
    %c0_7 = arith.constant 0 : index
    %c0_8 = arith.constant 0 : index
    %11 = vector.load %arg8[%c0_7, %c0_8] : memref<8x256xf32, #tpu.memory_space<vmem>>, vector<8x256xf32>
    %12 = arith.truncf %10 : vector<8x256xf32> to vector<8x256xbf16>
    %c0_9 = arith.constant 0 : index
    %c0_10 = arith.constant 0 : index
    %13 = vector.load %arg5[%c0_9, %c0_10] : memref<256x256xbf16, #tpu.memory_space<vmem>>, vector<256x256xbf16>
    %cst_11 = arith.constant dense<0.000000e+00> : vector<8x256xf32>
    %14 = tpu.matmul %12, %13, %cst_11 {dimension_numbers = #tpu.dot_dimension_numbers<[1], [0], [0], [1], [0, 0, 1, 1], [], []>} : vector<8x256xbf16>, vector<256x256xbf16>, vector<8x256xf32> -> vector<8x256xf32>
    %15 = arith.addf %11, %14 : vector<8x256xf32>
    %c0_12 = arith.constant 0 : index
    %c0_13 = arith.constant 0 : index
    %16 = vector.load %arg8[%c0_12, %c0_13] : memref<8x256xf32, #tpu.memory_space<vmem>>, vector<8x256xf32>
    tpu.vector_store %arg8[%c0_12, %c0_13], %15 {strides = array<i32>} : memref<8x256xf32, #tpu.memory_space<vmem>>, vector<8x256xf32>,
    %c0_i32_14 = arith.constant 0 : i32
    %17 = arith.cmpi eq, %arg1, %c0_i32_14 : i32
    %18 = arith.extui %17 : i1 to i32
    %c0_i32_15 = arith.constant 0 : i32
    %19 = arith.cmpi ne, %18, %c0_i32_15 : i32
    scf.if %19 {
      %c0_16 = arith.constant 0 : index
      %c0_17 = arith.constant 0 : index
      %20 = vector.load %arg8[%c0_16, %c0_17] : memref<8x256xf32, #tpu.memory_space<vmem>>, vector<8x256xf32>
      %c0_18 = arith.constant 0 : index
      %c0_19 = arith.constant 0 : index
      %21 = vector.load %arg6[%c0_18, %c0_19] : memref<1x256xf32, #tpu.memory_space<vmem>>, vector<1x256xf32>
      %22 = vector.broadcast %21 : vector<1x256xf32> to vector<8x256xf32>
      %23 = arith.addf %20, %22 : vector<8x256xf32>
      %c0_20 = arith.constant 0 : index
      %c0_21 = arith.constant 0 : index
      %24 = vector.load %arg7[%c0_20, %c0_21] : memref<8x256xf32, #tpu.memory_space<vmem>>, vector<8x256xf32>
      tpu.vector_store %arg7[%c0_20, %c0_21], %23 {strides = array<i32>} : memref<8x256xf32, #tpu.memory_space<vmem>>, vector<8x256xf32>,
    } else {
    }
    return
  }
  func.func @transform_0(%arg0: i32, %arg1: i32) -> (i32, i32) {
    %c0_i32 = arith.constant 0 : i32
    %c0_i32_0 = arith.constant 0 : i32
    return %arg0, %c0_i32 : i32, i32
  }
  func.func @transform_1(%arg0: i32, %arg1: i32) -> (i32, i32) {
    %c0_i32 = arith.constant 0 : i32
    %c0_i32_0 = arith.constant 0 : i32
    return %c0_i32, %arg1 : i32, i32
  }
  func.func @transform_2(%arg0: i32, %arg1: i32) -> (i32, i32) {
    %c0_i32 = arith.constant 0 : i32
    %c0_i32_0 = arith.constant 0 : i32
    return %c0_i32, %arg1 : i32, i32
  }
  func.func @transform_3(%arg0: i32, %arg1: i32) -> (i32, i32) {
    %c0_i32 = arith.constant 0 : i32
    %c0_i32_0 = arith.constant 0 : i32
    return %arg1, %c0_i32 : i32, i32
  }
  func.func @transform_4(%arg0: i32, %arg1: i32) -> (i32, i32) {
    %c0_i32 = arith.constant 0 : i32
    %c0_i32_0 = arith.constant 0 : i32
    %c0_i32_1 = arith.constant 0 : i32
    return %c0_i32, %c0_i32_0 : i32, i32
  }
  func.func @transform_5(%arg0: i32, %arg1: i32) -> (i32, i32) {
    %c0_i32 = arith.constant 0 : i32
    %c0_i32_0 = arith.constant 0 : i32
    return %arg0, %c0_i32 : i32, i32
  }
}

</mosaic_0001>

<bundles_post_ra>
// kernel: tpu_custom_call.1
= control target key start
LH: loop header
LB: loop body
LE: loop exit
PB: predicated region body
PF: predicated region fallthrough
CT: control target
= control target key end

     0   :  { %10 = vsyncpa [#allocation4], 0  ;;  %s965_s0 = inlined_call_operand.hbm [shape: bf16[8,256], index: 0, kind: input, shape index: {}]   ;;  %s966_s1 = inlined_call_operand.hbm [shape: bf16[256,256], index: 1, kind: input, shape index: {}]   ;;  %s967_s2 = inlined_call_operand.vmem [shape: f32[1,256], index: 2, kind: input, shape index: {}]   ;;  %s968_s3 = inlined_call_operand.hbm [shape: bf16[256,256], index: 3, kind: input, shape index: {}]   ;;  %s969_s4 = inlined_call_operand.vmem [shape: f32[1,256], index: 4, kind: input, shape index: {}]   ;;  %s970_s5 = inlined_call_operand.hbm [shape: f32[8,256], index: 5, kind: output, shape index: {}]  }
   0x1   :  { %11 = vsyncpa [#allocation7], 0 }
   0x2   :  { %12 = vsyncpa [#allocation5], 0  ;;  %s863_s18 = smov [#allocation6]   ;;  %s769_s22 = scalar_lea.hbm %s966_s1, 4096 }
   0x3   :  { %s28_s19 = sshll.u32 %s863_s18, 4  ;;  %p770_p0 = scmp.ne.s32.totalorder %s966_s1, %s769_s22  ;;  %s29_s19 = int_to_ptr.vmem [resolvable:$true] %s28_s19 }
   0x4   :  { %p773_p1 = scmp.lt.u32.totalorder %s769_s22, %s966_s1 }
   0x6   :  { %p775_p2 = pnand %p773_p1, %p770_p0 }
   0x8   :  { %778 = shalt.err (!%p775_p2)
}
   0x9   :  { %s779_s27 = scalar_lea.vmem %s29_s19, 4096  ;;  %p784_p4 = scmp.lt.s32.totalorder %s29_s19, %s29_s19 }
   0xa   :  { %p780_p3 = scmp.ne.s32.totalorder %s29_s19, %s779_s27  ;;  %p785_p5 = scmp.lt.s32.totalorder %s779_s27, %s779_s27 }
   0xc   :  { %p786_p6 = por %p785_p5, %p784_p4 }
   0xe   :  { %p787_p7 = pnand %p786_p6, %p780_p3 }
  0x10   :  { %790 = shalt.err (!%p787_p7)
}
  0x11   :  { %s864_s28 = smov 128   ;;  %s865_s29 = smov 8  }
  0x12   :  { %34 = dma.hbm_to_vmem [thread:$0]  %s966_s1, 4096, %s29_s19, [#allocation7], %s864_s28, %s864_s28, %s865_s29  }
  0x13   :  { %s866_s7 = smov [#allocation3]   ;;  %s867_s9 = smov [#allocation8]  }
  0x14   :  { %s19_s8 = sshll.u32 %s866_s7, 4  ;;  %s42_s10 = sshll.u32 %s867_s9, 4  ;;  %s20_s8 = int_to_ptr.vmem [resolvable:$true] %s19_s8  ;;  %s43_s10 = int_to_ptr.vmem [resolvable:$true] %s42_s10 }
  0x15   :  { %s791_s13 = scalar_lea.hbm %s965_s0, 128 }
  0x16   :  { %p792_p8 = scmp.ne.s32.totalorder %s965_s0, %s791_s13  ;;  %p795_p9 = scmp.lt.u32.totalorder %s791_s13, %s965_s0 }
  0x18   :  { %p797_p10 = pnand %p795_p9, %p792_p8 }
  0x1a   :  { %800 = shalt.err (!%p797_p10)
}
  0x1b   :  { %s801_s1 = scalar_lea.vmem %s20_s8, 128  ;;  %p806_p12 = scmp.lt.s32.totalorder %s20_s8, %s20_s8 }
  0x1c   :  { %p802_p11 = scmp.ne.s32.totalorder %s20_s8, %s801_s1  ;;  %p807_p13 = scmp.lt.s32.totalorder %s801_s1, %s801_s1 }
  0x1e   :  { %p808_p0 = por %p807_p13, %p806_p12 }
  0x20   :  { %p809_p1 = pnand %p808_p0, %p802_p11 }
  0x22   :  { %812 = shalt.err (!%p809_p1)
}
  0x23   :  { %22 = dma.hbm_to_vmem [thread:$0]  %s965_s0, 128, %s20_s8, [#allocation4]  }
  0x24   :  { %s813_s22 = scalar_lea.hbm %s968_s3, 4096 }
  0x25   :  { %p814_p2 = scmp.ne.s32.totalorder %s968_s3, %s813_s22  ;;  %p817_p3 = scmp.lt.u32.totalorder %s813_s22, %s968_s3 }
  0x27   :  { %p819_p4 = pnand %p817_p3, %p814_p2 }
  0x29   :  { %822 = shalt.err (!%p819_p4)
}
  0x2a   :  { %s823_s27 = scalar_lea.vmem %s43_s10, 4096  ;;  %p828_p6 = scmp.lt.s32.totalorder %s43_s10, %s43_s10 }
  0x2b   :  { %p824_p5 = scmp.ne.s32.totalorder %s43_s10, %s823_s27  ;;  %p829_p7 = scmp.lt.s32.totalorder %s823_s27, %s823_s27 }
  0x2d   :  { %p830_p8 = por %p829_p7, %p828_p6 }
  0x2f   :  { %p831_p9 = pnand %p830_p8, %p824_p5 }
  0x31   :  { %834 = shalt.err (!%p831_p9)
}
  0x32   :  { %48 = dma.hbm_to_vmem [thread:$0]  %s968_s3, 4096, %s43_s10, [#allocation7], %s864_s28, %s864_s28, %s865_s29  }
  0x33   :  { %857 = dma.done.wait [#allocation4], 128  }
  0x34   :  { %858 = vsyncadd [#allocation4], 4294967168 }
  0x35   :  { %859 = dma.done.wait [#allocation7], 8192  }
  0x36   :  { %860 = vsyncadd [#allocation7], 4294959104  ;;  %v671_v0 = vld [vmem:[#allocation6 + $0x4] ss:$8 sps:$4 sm:$0xff]   ;;  %v673_v1 = vld [vmem:[#allocation6] ss:$8 sps:$4 sm:$0xff]  }
  0x37   :  { %278 = vmatprep.subr.bf16.mxu0 %v671_v0  ;;  %v674_v2 = vld [vmem:[#allocation6 + $0x14] ss:$8 sps:$4 sm:$0xff]   ;;  %v676_v3 = vld [vmem:[#allocation6 + $0x10] ss:$8 sps:$4 sm:$0xff]   ;;  %v677_v4 = vld [vmem:[#allocation6 + $0x24] ss:$8 sps:$4 sm:$0xff]  }
  0x38   :  { %279 = vmatpush1.bf16.msra.mxu0 %v673_v1  ;;  %v679_v5 = vld [vmem:[#allocation6 + $0x20] ss:$8 sps:$4 sm:$0xff]   ;;  %v680_v6 = vld [vmem:[#allocation6 + $0x34] ss:$8 sps:$4 sm:$0xff]   ;;  %v682_v7 = vld [vmem:[#allocation6 + $0x30] ss:$8 sps:$4 sm:$0xff]  }
  0x39   :  { %280 = vmatprep.subr.bf16.mxu0 %v674_v2  ;;  %v683_v8 = vld [vmem:[#allocation6 + $0x44] ss:$8 sps:$4 sm:$0xff]   ;;  %v685_v9 = vld [vmem:[#allocation6 + $0x40] ss:$8 sps:$4 sm:$0xff]   ;;  %v686_v10 = vld [vmem:[#allocation6 + $0x54] ss:$8 sps:$4 sm:$0xff]  }
  0x3a   :  { %v688_v11 = vld [vmem:[#allocation6 + $0x50] ss:$8 sps:$4 sm:$0xff]   ;;  %v689_v12 = vld [vmem:[#allocation6 + $0x64] ss:$8 sps:$4 sm:$0xff]   ;;  %v691_v13 = vld [vmem:[#allocation6 + $0x60] ss:$8 sps:$4 sm:$0xff]  }
  0x3b   :  { %v941_v14 = vld [vmem:[#allocation3] sm:$0xff]  ;;  %v721_v16 = vld [vmem:[#allocation8 + $0x4] ss:$8 sps:$4 sm:$0xff]   ;;  %v723_v17 = vld [vmem:[#allocation8] ss:$8 sps:$4 sm:$0xff]  }
  0x3c   :  { %281 = vmatpush1.bf16.msra.mxu0 %v676_v3  ;;  %v600_v15 = vcombine.high %v941_v14, %v941_v14  ;;  %v724_v18 = vld [vmem:[#allocation8 + $0x14] ss:$8 sps:$4 sm:$0xff]   ;;  %517 = vmatprep.subr.bf16.mxu1 %v721_v16  ;;  %v694_v20 = vld [vmem:[#allocation6 + $0x70] ss:$8 sps:$4 sm:$0xff]   ;;  %v727_v22 = vld [vmem:[#allocation8 + $0x24] ss:$8 sps:$4 sm:$0xff]   ;;  %v599_v55 = vcombine.low %v941_v14, %v941_v14  ;;  %v101_v3 = vlaneseq }
  0x3d   :  { %282 = vmatprep.subr.bf16.mxu0 %v677_v4  ;;  %v692_v19 = vld [vmem:[#allocation6 + $0x74] ss:$8 sps:$4 sm:$0xff]   ;;  %518 = vmatpush1.bf16.msra.mxu1 %v723_v17  ;;  %v726_v21 = vld [vmem:[#allocation8 + $0x10] ss:$8 sps:$4 sm:$0xff]   ;;  %v695_v23 = vld [vmem:[#allocation6 + $0x84] ss:$8 sps:$4 sm:$0xff]  }
  0x3e   :  { %310 = vmatprep.mubr.bf16.mxu0 %v600_v15  ;;  %519 = vmatprep.subr.bf16.mxu1 %v724_v18  ;;  %v697_v24 = vld [vmem:[#allocation6 + $0x80] ss:$8 sps:$4 sm:$0xff]   ;;  %v730_v26 = vld [vmem:[#allocation8 + $0x34] ss:$8 sps:$4 sm:$0xff]   ;;  %v700_v28 = vld [vmem:[#allocation6 + $0x90] ss:$8 sps:$4 sm:$0xff]  }
  0x3f   :  { %v729_v25 = vld [vmem:[#allocation8 + $0x20] ss:$8 sps:$4 sm:$0xff]   ;;  %v698_v27 = vld [vmem:[#allocation6 + $0x94] ss:$8 sps:$4 sm:$0xff]   ;;  %v732_v29 = vld [vmem:[#allocation8 + $0x30] ss:$8 sps:$4 sm:$0xff]  }
  0x40   :  { %283 = vmatpush1.bf16.msra.mxu0 %v679_v5  ;;  %v733_v30 = vld [vmem:[#allocation8 + $0x44] ss:$8 sps:$4 sm:$0xff]   ;;  %v703_v32 = vld [vmem:[#allocation6 + $0xa0] ss:$8 sps:$4 sm:$0xff]   ;;  %v736_v34 = vld [vmem:[#allocation8 + $0x54] ss:$8 sps:$4 sm:$0xff]  }
  0x41   :  { %284 = vmatprep.subr.bf16.mxu0 %v680_v6  ;;  %520 = vmatpush1.bf16.msra.mxu1 %v726_v21  ;;  %v701_v31 = vld [vmem:[#allocation6 + $0xa4] ss:$8 sps:$4 sm:$0xff]   ;;  %v735_v33 = vld [vmem:[#allocation8 + $0x40] ss:$8 sps:$4 sm:$0xff]   ;;  %v704_v35 = vld [vmem:[#allocation6 + $0xb4] ss:$8 sps:$4 sm:$0xff]  }
  0x42   :  { %521 = vmatprep.subr.bf16.mxu1 %v727_v22  ;;  %v738_v36 = vld [vmem:[#allocation8 + $0x50] ss:$8 sps:$4 sm:$0xff]   ;;  %v739_v38 = vld [vmem:[#allocation8 + $0x64] ss:$8 sps:$4 sm:$0xff]   ;;  %v741_v40 = vld [vmem:[#allocation8 + $0x60] ss:$8 sps:$4 sm:$0xff]  }
  0x43   :  { %v706_v37 = vld [vmem:[#allocation6 + $0xb0] ss:$8 sps:$4 sm:$0xff]   ;;  %v707_v39 = vld [vmem:[#allocation6 + $0xc4] ss:$8 sps:$4 sm:$0xff]   ;;  %v709_v41 = vld [vmem:[#allocation6 + $0xc0] ss:$8 sps:$4 sm:$0xff]  }
  0x44   :  { %285 = vmatpush1.bf16.msra.mxu0 %v682_v7  ;;  %v742_v42 = vld [vmem:[#allocation8 + $0x74] ss:$8 sps:$4 sm:$0xff]   ;;  %v744_v44 = vld [vmem:[#allocation8 + $0x70] ss:$8 sps:$4 sm:$0xff]   ;;  %v745_v46 = vld [vmem:[#allocation8 + $0x84] ss:$8 sps:$4 sm:$0xff]  }
  0x45   :  { %286 = vmatprep.subr.bf16.mxu0 %v683_v8  ;;  %522 = vmatpush1.bf16.msra.mxu1 %v729_v25  ;;  %v710_v43 = vld [vmem:[#allocation6 + $0xd4] ss:$8 sps:$4 sm:$0xff]   ;;  %v712_v45 = vld [vmem:[#allocation6 + $0xd0] ss:$8 sps:$4 sm:$0xff]   ;;  %v713_v47 = vld [vmem:[#allocation6 + $0xe4] ss:$8 sps:$4 sm:$0xff]  }
  0x46   :  { %523 = vmatprep.subr.bf16.mxu1 %v730_v26  ;;  %v747_v48 = vld [vmem:[#allocation8 + $0x80] ss:$8 sps:$4 sm:$0xff]   ;;  %v748_v50 = vld [vmem:[#allocation8 + $0x94] ss:$8 sps:$4 sm:$0xff]   ;;  %v750_v52 = vld [vmem:[#allocation8 + $0x90] ss:$8 sps:$4 sm:$0xff]  }
  0x47   :  { %v715_v49 = vld [vmem:[#allocation6 + $0xe0] ss:$8 sps:$4 sm:$0xff]   ;;  %v716_v51 = vld [vmem:[#allocation6 + $0xf4] ss:$8 sps:$4 sm:$0xff]   ;;  %v718_v53 = vld [vmem:[#allocation6 + $0xf0] ss:$8 sps:$4 sm:$0xff]  }
  0x48   :  { %287 = vmatpush1.bf16.msra.mxu0 %v685_v9  ;;  %v751_v54 = vld [vmem:[#allocation8 + $0xa4] ss:$8 sps:$4 sm:$0xff]   ;;  %v753_v56 = vld [vmem:[#allocation8 + $0xa0] ss:$8 sps:$4 sm:$0xff]   ;;  %v754_v57 = vld [vmem:[#allocation8 + $0xb4] ss:$8 sps:$4 sm:$0xff]  }
  0x49   :  { %288 = vmatprep.subr.bf16.mxu0 %v686_v10  ;;  %524 = vmatpush1.bf16.msra.mxu1 %v732_v29  ;;  %v756_v58 = vld [vmem:[#allocation8 + $0xb0] ss:$8 sps:$4 sm:$0xff]   ;;  %v757_v59 = vld [vmem:[#allocation8 + $0xc4] ss:$8 sps:$4 sm:$0xff]   ;;  %v759_v60 = vld [vmem:[#allocation8 + $0xc0] ss:$8 sps:$4 sm:$0xff]  }
  0x4a   :  { %525 = vmatprep.subr.bf16.mxu1 %v733_v30  ;;  %v760_v61 = vld [vmem:[#allocation8 + $0xd4] ss:$8 sps:$4 sm:$0xff]   ;;  %v762_v62 = vld [vmem:[#allocation8 + $0xd0] ss:$8 sps:$4 sm:$0xff]   ;;  %v763_v63 = vld [vmem:[#allocation8 + $0xe4] ss:$8 sps:$4 sm:$0xff]  }
  0x4b   :  { %v765_v0 = vld [vmem:[#allocation8 + $0xe0] ss:$8 sps:$4 sm:$0xff]   ;;  %v766_v1 = vld [vmem:[#allocation8 + $0xf4] ss:$8 sps:$4 sm:$0xff]   ;;  %v768_v2 = vld [vmem:[#allocation8 + $0xf0] ss:$8 sps:$4 sm:$0xff]  }
  0x4c   :  { %289 = vmatpush1.bf16.msra.mxu0 %v688_v11  ;;  %v102_v4 = vshrl.u32 %v101_v3, 7  ;;  %v99_v6 = vld [vmem:[%s967_s2] sm:$0x3]  ;;  %s868_s2 = smov [#allocation9]  }
  0x4d   :  { %290 = vmatprep.subr.bf16.mxu0 %v689_v12  ;;  %526 = vmatpush1.bf16.msra.mxu1 %v735_v33  ;;  %s589_s7 = sshll.u32 %s868_s2, 4  ;;  %s590_s7 = int_to_ptr.vmem [resolvable:$true] %s589_s7 }
  0x4e   :  { %527 = vmatprep.subr.bf16.mxu1 %v736_v34  ;;  %v103_v5 = vsub.s32 0, %v102_v4  ;;  %v107_v7 = vsub.s32 1, %v102_v4  ;;  %s835_s8 = scalar_lea.vmem %s590_s7, 256  ;;  %p840_p11 = scmp.lt.s32.totalorder %s590_s7, %s590_s7 }
  0x4f   :  { %p836_p10 = scmp.ne.s32.totalorder %s590_s7, %s835_s8  ;;  %p841_p12 = scmp.lt.s32.totalorder %s835_s8, %s835_s8 }
  0x50   :  { %291 = vmatpush1.bf16.msra.mxu0 %v691_v13  ;;  %v104_v8 = vrot.slane %v99_v6, %v103_v5  ;;  %v108_v9 = vrot.slane %v99_v6, %v107_v7 }
  0x51   :  { %292 = vmatprep.subr.bf16.mxu0 %v692_v19  ;;  %528 = vmatpush1.bf16.msra.mxu1 %v738_v36  ;;  %p842_p13 = por %p841_p12, %p840_p11 }
  0x52   :  { %529 = vmatprep.subr.bf16.mxu1 %v739_v38 }
  0x53   :  { %p843_p0 = pnand %p842_p13, %p836_p10 }
  0x54   :  { %293 = vmatpush1.bf16.msra.mxu0 %v694_v20  ;;  %v567_v20 = vld [vmem:[%s969_s4] sm:$0x3] }
  0x55   :  { %294 = vmatprep.subr.bf16.mxu0 %v695_v23  ;;  %530 = vmatpush1.bf16.msra.mxu1 %v741_v40  ;;  %v572_v21 = vrot.slane %v567_v20, %v103_v5  ;;  %v576_v22 = vrot.slane %v567_v20, %v107_v7 }
  0x56   :  { %531 = vmatprep.subr.bf16.mxu1 %v742_v42 }
  0x58   :  { %295 = vmatpush1.bf16.msra.mxu0 %v697_v24 }
  0x59   :  { %296 = vmatprep.subr.bf16.mxu0 %v698_v27  ;;  %532 = vmatpush1.bf16.msra.mxu1 %v744_v44 }
  0x5a   :  { %533 = vmatprep.subr.bf16.mxu1 %v745_v46 }
  0x5c   :  { %297 = vmatpush1.bf16.msra.mxu0 %v700_v28 }
  0x5d   :  { %298 = vmatprep.subr.bf16.mxu0 %v701_v31  ;;  %534 = vmatpush1.bf16.msra.mxu1 %v747_v48 }
  0x5e   :  { %535 = vmatprep.subr.bf16.mxu1 %v748_v50 }
  0x60   :  { %299 = vmatpush1.bf16.msra.mxu0 %v703_v32 }
  0x61   :  { %300 = vmatprep.subr.bf16.mxu0 %v704_v35  ;;  %536 = vmatpush1.bf16.msra.mxu1 %v750_v52 }
  0x62   :  { %537 = vmatprep.subr.bf16.mxu1 %v751_v54 }
  0x64   :  { %301 = vmatpush1.bf16.msra.mxu0 %v706_v37 }
  0x65   :  { %302 = vmatprep.subr.bf16.mxu0 %v707_v39  ;;  %538 = vmatpush1.bf16.msra.mxu1 %v753_v56 }
  0x66   :  { %539 = vmatprep.subr.bf16.mxu1 %v754_v57 }
  0x68   :  { %303 = vmatpush1.bf16.msra.mxu0 %v709_v41 }
  0x69   :  { %304 = vmatprep.subr.bf16.mxu0 %v710_v43  ;;  %540 = vmatpush1.bf16.msra.mxu1 %v756_v58 }
  0x6a   :  { %541 = vmatprep.subr.bf16.mxu1 %v757_v59 }
  0x6c   :  { %305 = vmatpush1.bf16.msra.mxu0 %v712_v45 }
  0x6d   :  { %306 = vmatprep.subr.bf16.mxu0 %v713_v47  ;;  %542 = vmatpush1.bf16.msra.mxu1 %v759_v60 }
  0x6e   :  { %543 = vmatprep.subr.bf16.mxu1 %v760_v61 }
  0x70   :  { %307 = vmatpush1.bf16.msra.mxu0 %v715_v49 }
  0x71   :  { %308 = vmatprep.subr.bf16.mxu0 %v716_v51  ;;  %544 = vmatpush1.bf16.msra.mxu1 %v762_v62 }
  0x72   :  { %545 = vmatprep.subr.bf16.mxu1 %v763_v63 }
  0x74   :  { %309 = vmatpush1.bf16.msra.mxu0 %v718_v53 }
  0x75   :  { %546 = vmatpush1.bf16.msra.mxu1 %v765_v0 }
  0x76   :  { %547 = vmatprep.subr.bf16.mxu1 %v766_v1 }
  0x77   :  { %311 = vmatmul.mubr.bf16.vlgmr.msra.gmra.mrb[0].mxu0 %v599_v55 }
  0x79   :  { %548 = vmatpush1.bf16.msra.mxu1 %v768_v2 }
 0x14a   :  { %v312_v10 = vpop.f32.mrb[0].mxu0 }
 0x14b   :  { %v313_v11 = vadd.f32 %v312_v10, %v104_v8  ;;  %v314_v12 = vpop.f32.mrb[1].mxu0 }
 0x14c   :  { %v315_v13 = vadd.f32 %v314_v12, %v108_v9  ;;  %v316_v14 = vpop.f32.mrb[2].mxu0 }
 0x14d   :  { %v319_v15 = vmax.f32 %v313_v11, 0.0  ;;  %v317_v16 = vpop.f32.mrb[3].mxu0 }
 0x14e   :  { %v320_v17 = vmax.f32 %v315_v13, 0.0 }
 0x14f   :  { %v323_v19 = vpack.c.bf16 %v319_v15, %v319_v15 }
 0x150   :  { %v324_v18 = vpack.c.bf16 %v320_v17, %v320_v17 }
 0x152   :  { %549 = vmatprep.mubr.bf16.mxu1 %v324_v18 }
 0x153   :  { %550 = vmatmul.mubr.bf16.vlgmr.msra.gmra.mrb[0].mxu1 %v323_v19 }
 0x226   :  { %v551_v23 = vpop.f32.mrb[0].mxu1 }
 0x227   :  { %v579_v24 = vadd.f32 %v572_v21, %v551_v23  ;;  %v553_v25 = vpop.f32.mrb[1].mxu1 }
 0x228   :  { %v580_v26 = vadd.f32 %v576_v22, %v553_v25  ;;  %v555_v27 = vpop.f32.mrb[2].mxu1 }
 0x229   :  { %581 = vst [vmem:[#allocation9] sm:$0xff] %v579_v24  ;;  %v556_v28 = vpop.f32.mrb[3].mxu1 }
 0x22a   :  { %582 = vst [vmem:[#allocation9 + $0x8] sm:$0xff] %v580_v26 }
 0x22b   :  { %846 = shalt.err (!%p843_p0)
}
 0x22c   :  { %s847_s10 = scalar_lea.hbm %s970_s5, 256 }
 0x22d   :  { %p848_p1 = scmp.ne.s32.totalorder %s970_s5, %s847_s10  ;;  %p851_p2 = scmp.lt.u32.totalorder %s847_s10, %s970_s5 }
 0x22f   :  { %p853_p3 = pnand %p851_p2, %p848_p1 }
 0x231   :  { %856 = shalt.err (!%p853_p3)
}
 0x232   :  { %592 = dma.vmem_to_hbm [thread:$0]  %s590_s7, 256, %s970_s5, [#allocation5]  }
 0x233   :  { %861 = dma.done.wait [#allocation5], 256  }
 0x234   :  { %862 = vsyncadd [#allocation5], 4294967040 }
 0x235   :  { %596 = vsyncpa [#allocation4], 1 }
 0x236   :  { %597 = vsyncpa [#allocation7], 1 }
 0x237   :  { %598 = vsyncpa [#allocation5], 1 }

</bundles_post_ra>
